<compile_context>
chip_gen: v7x
topology: tpu7x:2x2x1
jax: 0.10.0
libtpu: 0.0.40
codegen_flags: <defaults>
</compile_context>

<pallas_src>
import functools

import jax
import jax.numpy as jnp
from jax.experimental import pallas as pl
from jax.experimental.pallas import tpu as pltpu


def _self_attention_kernel(x_ref, w1_ref, b1_ref, w2s_ref, out_ref, *, n):
    rows, _ = x_ref.shape
    bt = rows // n
    d_out = w1_ref.shape[1]

    # One stacked MXU matmul for every bag of this tile: bf16 operands,
    # f32 accumulation.  (bag_tile*N, D_in) @ (D_in, D_out).
    h = jnp.dot(x_ref[...], w1_ref[...], preferred_element_type=jnp.float32)
    h = h + b1_ref[...]
    h = jnp.maximum(h, 0.2 * h)                         # LeakyReLU(0.2), f32

    h3 = h.reshape(bt, n, d_out)                        # (bt, N, D_out)

    # Attention logits: e_i = h_i . w2_self  (center/b2 halves of compute_e
    # are per-bag constants and cancel inside the softmax).
    e = jnp.sum(h3 * w2s_ref[...], axis=-1)             # (bt, N), lane-dense

    # Softmax over the instance axis of each bag (all 2-D intermediates).
    e_max = jnp.max(e, axis=-1, keepdims=True)
    p = jnp.exp(e - e_max)                              # EUP
    denom = jnp.sum(p, axis=-1, keepdims=True)
    alpha = p / denom                                   # exact normalization

    # Aggregated instance per bag: out_b = sum_i alpha_{b,i} * h_{b,i,:}
    out_ref[...] = jnp.sum(alpha[..., None] * h3, axis=1).astype(out_ref.dtype)


def _pick_bag_tile(b, n):
    """Static heuristic for the bag tile.

    Small batches: one grid step (no padding, no grid overhead).
    Large batches: >= 512 stacked MXU rows per step, tile a multiple of 64
    bags, and >= 4 grid steps so each of v7x's two TensorCores gets >= 2
    pipelined steps (DMA/compute overlap); same rule keeps >= 2-3 steps on
    the single-core v5e/v6e.
    """
    if b * n <= 4096:
        return b
    tile = -(-512 // n)                 # >= 512 rows per grid step
    tile = -(-tile // 64) * 64          # multiple of 64 bags
    while tile >= 128 and -(-b // tile) < 4:
        tile //= 2
    return max(1, min(tile, b))


@functools.partial(jax.jit, static_argnames=("bag_tile", "compute_dtype"))
def self_attention_batched(bags, w1, b1, w2, b2, *, bag_tile=None,
                           compute_dtype=jnp.bfloat16):
    """Batched SelfAttention forward.

    bags: (B, N, D_in)       — B bags of N instances each
    w1:   (D_in, D_out)      — ascend_dim weight (stored transposed vs torch)
    b1:   (D_out,)           — ascend_dim bias
    w2:   (2*D_out, 1)       — compute_e weight (stored transposed vs torch)
    b2:   (1,)               — compute_e bias (softmax-invariant; unused)
    returns (B, D_out) float32
    """
    del b2  # constant shift across the softmax axis -> cancels exactly
    b, n, d_in = bags.shape
    d_out = w1.shape[1]

    if bag_tile is None:
        bag_tile = _pick_bag_tile(b, n)

    # Only the "self" half of compute_e matters; keep it lane-dense (1, D_out).
    w2_self = w2[d_out:, 0].reshape(1, d_out).astype(jnp.float32)
    b1_row = b1.reshape(1, d_out).astype(jnp.float32)

    # Pad the bag axis up to a multiple of the tile (padded rows sliced off).
    n_tiles = pl.cdiv(b, bag_tile)
    b_pad = n_tiles * bag_tile
    if b_pad != b:
        bags = jnp.pad(bags, ((0, b_pad - b), (0, 0), (0, 0)))

    # Flatten bags in the wrapper: the MXU LHS is a flat, lane-dense 2-D slab
    # (simple 2-D DMA descriptor, no in-kernel relayout).  bf16 halves the
    # HBM bytes of the bandwidth-bound bag read.
    x = bags.reshape(b_pad * n, d_in).astype(compute_dtype)
    w1c = w1.astype(compute_dtype)

    rows_per_tile = bag_tile * n

    # Scoped-VMEM budget: 2x double-buffered input block + double-buffered
    # resident weights + 2x output block, with headroom.  Only set explicitly
    # when it could exceed v5e's 16 MiB scoped default; capped under v7x's
    # 64 MiB physical VMEM.
    item = jnp.dtype(compute_dtype).itemsize
    in_bytes = 2 * rows_per_tile * d_in * item
    wt_bytes = 2 * (d_in * d_out * item + 2 * d_out * 4)
    out_bytes = 2 * bag_tile * d_out * 4
    budget = int(1.5 * (in_bytes + wt_bytes + out_bytes)) + (2 << 20)
    vmem_limit = min(budget, 64 << 20) if budget > (16 << 20) else None

    out = pl.pallas_call(
        functools.partial(_self_attention_kernel, n=n),
        out_shape=jax.ShapeDtypeStruct((b_pad, d_out), jnp.float32),
        grid=(n_tiles,),
        in_specs=[
            pl.BlockSpec((rows_per_tile, d_in), lambda i: (i, 0)),
            pl.BlockSpec((d_in, d_out), lambda i: (0, 0)),   # weights stay
            pl.BlockSpec((1, d_out), lambda i: (0, 0)),      # VMEM-resident
            pl.BlockSpec((1, d_out), lambda i: (0, 0)),      # (DMA'd once)
        ],
        out_specs=pl.BlockSpec((bag_tile, d_out), lambda i: (i, 0)),
        compiler_params=pltpu.CompilerParams(
            dimension_semantics=("parallel",),
            vmem_limit_bytes=vmem_limit),
    )(x, w1c, b1_row, w2_self)

    return out[:b]


def self_attention(bag, w1, b1, w2, b2):
    """Single-bag forward matching SelfAttention.forward: (N, D_in) -> (1, D_out)."""
    return self_attention_batched(bag[None], w1, b1, w2, b2, bag_tile=1)


if __name__ == "__main__":
    key = jax.random.PRNGKey(0)
    k_bag, k_w1, k_b1, k_w2, k_b2, k_bag2 = jax.random.split(key, 6)

    # 16 bags of 8 instances each; lane-friendly feature widths.
    B, N, D_IN, D_OUT = 16, 8, 128, 128

    bags = jax.random.normal(k_bag, (B, N, D_IN), dtype=jnp.float32)

    # deterministic synthetic parameters (nn.Linear-style uniform fan-in init)
    lim1 = 1.0 / (D_IN ** 0.5)
    lim2 = 1.0 / ((2 * D_OUT) ** 0.5)
    w1 = jax.random.uniform(k_w1, (D_IN, D_OUT), jnp.float32, -lim1, lim1)
    b1 = jax.random.uniform(k_b1, (D_OUT,), jnp.float32, -lim1, lim1)
    w2 = jax.random.uniform(k_w2, (2 * D_OUT, 1), jnp.float32, -lim2, lim2)
    b2 = jax.random.uniform(k_b2, (1,), jnp.float32, -lim2, lim2)

    # auto bag_tile -> single grid step (bag_tile == B) for this demo size
    out = jax.block_until_ready(self_attention_batched(bags, w1, b1, w2, b2))

    # pure-JAX reference of the EXACT torch forward (including the center / b2
    # terms the kernel eliminates algebraically), per bag.
    def ref_forward(bag, w1_, b1_):
        h = bag @ w1_ + b1_
        h = jnp.where(h >= 0, h, 0.2 * h)
        center = jnp.tile(h[0:1, :], (bag.shape[0], 1))
        e = (jnp.concatenate([center, h], axis=1) @ w2 + b2).reshape(1, -1)
        alpha = jax.nn.softmax(e, axis=1)
        return (alpha @ h)[0]

    # exact f32 reference
    ref_f32 = jax.vmap(lambda bg: ref_forward(bg, w1, b1))(bags)
    # reference on the same bf16-rounded inputs the kernel consumes
    bags_bf = bags.astype(jnp.bfloat16).astype(jnp.float32)
    w1_bf = w1.astype(jnp.bfloat16).astype(jnp.float32)
    ref_bf = jax.vmap(lambda bg: ref_forward(bg, w1_bf, b1))(bags_bf)

    assert out.shape == (B, D_OUT), out.shape
    err_bf = float(jnp.max(jnp.abs(out - ref_bf)))
    assert jnp.allclose(out, ref_bf, atol=2e-3, rtol=2e-3), err_bf
    err_f32 = float(jnp.max(jnp.abs(out - ref_f32)))
    assert jnp.allclose(out, ref_f32, atol=5e-2, rtol=5e-2), err_f32

    # multi-tile + padding path (grid > 1, B not a multiple of bag_tile)
    B2 = 40
    bags2 = jax.random.normal(k_bag2, (B2, N, D_IN), dtype=jnp.float32)
    out2 = jax.block_until_ready(
        self_attention_batched(bags2, w1, b1, w2, b2, bag_tile=16))
    ref2 = jax.vmap(lambda bg: ref_forward(bg, w1, b1))(bags2)
    assert out2.shape == (B2, D_OUT), out2.shape
    assert jnp.allclose(out2, ref2, atol=5e-2, rtol=5e-2)

    # single-bag path matches the module's (1, D_out) output contract
    out1 = jax.block_until_ready(self_attention(bags[0], w1, b1, w2, b2))
    assert out1.shape == (1, D_OUT), out1.shape
    assert jnp.allclose(out1[0], ref_forward(bags[0], w1, b1), atol=5e-2, rtol=5e-2)

    print("KERNEL_OK")
</pallas_src>

<mosaic_0001>
module attributes {stable_mosaic.version = 11 : i64} {
  func.func @_self_attention_kernel(%arg0: i32, %arg1: memref<128x128xbf16, #tpu.memory_space<vmem>>, %arg2: memref<128x128xbf16, #tpu.memory_space<vmem>>, %arg3: memref<1x128xf32, #tpu.memory_space<vmem>>, %arg4: memref<1x128xf32, #tpu.memory_space<vmem>>, %arg5: memref<16x128xf32, #tpu.memory_space<vmem>>) attributes {dimension_semantics = [#tpu.dimension_semantics<parallel>], iteration_bounds = array<i64: 1>, scalar_prefetch = 0 : i64, scratch_operands = 0 : i64, tpu.core_type = #tpu.core_type<tc>, window_params = [{transform_indices = @transform_0, window_bounds = array<i64: 128, 128>}, {pipeline_mode = #tpu.pipeline_mode<synchronous>, transform_indices = @transform_1, window_bounds = array<i64: 128, 128>}, {pipeline_mode = #tpu.pipeline_mode<synchronous>, transform_indices = @transform_2, window_bounds = array<i64: 1, 128>}, {pipeline_mode = #tpu.pipeline_mode<synchronous>, transform_indices = @transform_3, window_bounds = array<i64: 1, 128>}, {transform_indices = @transform_4, window_bounds = array<i64: 16, 128>}]} {
    %c0 = arith.constant 0 : index
    %c0_0 = arith.constant 0 : index
    %0 = vector.load %arg1[%c0, %c0_0] : memref<128x128xbf16, #tpu.memory_space<vmem>>, vector<128x128xbf16>
    %c0_1 = arith.constant 0 : index
    %c0_2 = arith.constant 0 : index
    %1 = vector.load %arg2[%c0_1, %c0_2] : memref<128x128xbf16, #tpu.memory_space<vmem>>, vector<128x128xbf16>
    %cst = arith.constant dense<0.000000e+00> : vector<128x128xf32>
    %2 = tpu.matmul %0, %1, %cst {dimension_numbers = #tpu.dot_dimension_numbers<[1], [0], [0], [1], [0, 0, 1, 1], [], []>} : vector<128x128xbf16>, vector<128x128xbf16>, vector<128x128xf32> -> vector<128x128xf32>
    %c0_3 = arith.constant 0 : index
    %c0_4 = arith.constant 0 : index
    %3 = vector.load %arg3[%c0_3, %c0_4] : memref<1x128xf32, #tpu.memory_space<vmem>>, vector<1x128xf32>
    %4 = vector.broadcast %3 : vector<1x128xf32> to vector<128x128xf32>
    %5 = arith.addf %2, %4 : vector<128x128xf32>
    %cst_5 = arith.constant 2.000000e-01 : f32
    %6 = vector.broadcast %cst_5 : f32 to vector<128x128xf32>
    %7 = arith.mulf %6, %5 : vector<128x128xf32>
    %8 = arith.maximumf %5, %7 : vector<128x128xf32>
    %9 = vector.shape_cast %8 : vector<128x128xf32> to vector<16x8x128xf32>
    %c0_6 = arith.constant 0 : index
    %c0_7 = arith.constant 0 : index
    %10 = vector.load %arg4[%c0_6, %c0_7] : memref<1x128xf32, #tpu.memory_space<vmem>>, vector<1x128xf32>
    %11 = vector.shape_cast %10 : vector<1x128xf32> to vector<1x1x128xf32>
    %12 = vector.broadcast %11 : vector<1x1x128xf32> to vector<16x8x128xf32>
    %13 = arith.mulf %9, %12 : vector<16x8x128xf32>
    %cst_8 = arith.constant dense<0.000000e+00> : vector<16x8xf32>
    %14 = vector.multi_reduction <add>, %13, %cst_8 [2] : vector<16x8x128xf32> to vector<16x8xf32>
    %cst_9 = arith.constant dense<0xFF800000> : vector<16xf32>
    %15 = vector.multi_reduction <maximumf>, %14, %cst_9 [1] : vector<16x8xf32> to vector<16xf32>
    %16 = vector.shape_cast %15 : vector<16xf32> to vector<16x1xf32>
    %17 = vector.broadcast %16 : vector<16x1xf32> to vector<16x8xf32>
    %18 = arith.subf %14, %17 : vector<16x8xf32>
    %19 = math.exp %18 : vector<16x8xf32>
    %cst_10 = arith.constant dense<0.000000e+00> : vector<16xf32>
    %20 = vector.multi_reduction <add>, %19, %cst_10 [1] : vector<16x8xf32> to vector<16xf32>
    %21 = vector.shape_cast %20 : vector<16xf32> to vector<16x1xf32>
    %22 = vector.broadcast %21 : vector<16x1xf32> to vector<16x8xf32>
    %23 = arith.divf %19, %22 : vector<16x8xf32>
    %24 = vector.shape_cast %23 : vector<16x8xf32> to vector<16x8x1xf32>
    %25 = vector.broadcast %24 : vector<16x8x1xf32> to vector<16x8x128xf32>
    %26 = arith.mulf %25, %9 : vector<16x8x128xf32>
    %cst_11 = arith.constant dense<0.000000e+00> : vector<16x128xf32>
    %27 = vector.multi_reduction <add>, %26, %cst_11 [1] : vector<16x8x128xf32> to vector<16x128xf32>
    %c0_12 = arith.constant 0 : index
    %c0_13 = arith.constant 0 : index
    %28 = vector.load %arg5[%c0_12, %c0_13] : memref<16x128xf32, #tpu.memory_space<vmem>>, vector<16x128xf32>
    tpu.vector_store %arg5[%c0_12, %c0_13], %27 {strides = array<i32>} : memref<16x128xf32, #tpu.memory_space<vmem>>, vector<16x128xf32>,
    return
  }
  func.func @transform_0(%arg0: i32) -> (i32, i32) {
    %c0_i32 = arith.constant 0 : i32
    %c0_i32_0 = arith.constant 0 : i32
    return %arg0, %c0_i32 : i32, i32
  }
  func.func @transform_1(%arg0: i32) -> (i32, i32) {
    %c0_i32 = arith.constant 0 : i32
    %c0_i32_0 = arith.constant 0 : i32
    %c0_i32_1 = arith.constant 0 : i32
    return %c0_i32, %c0_i32_0 : i32, i32
  }
  func.func @transform_2(%arg0: i32) -> (i32, i32) {
    %c0_i32 = arith.constant 0 : i32
    %c0_i32_0 = arith.constant 0 : i32
    %c0_i32_1 = arith.constant 0 : i32
    return %c0_i32, %c0_i32_0 : i32, i32
  }
  func.func @transform_3(%arg0: i32) -> (i32, i32) {
    %c0_i32 = arith.constant 0 : i32
    %c0_i32_0 = arith.constant 0 : i32
    %c0_i32_1 = arith.constant 0 : i32
    return %c0_i32, %c0_i32_0 : i32, i32
  }
  func.func @transform_4(%arg0: i32) -> (i32, i32) {
    %c0_i32 = arith.constant 0 : i32
    %c0_i32_0 = arith.constant 0 : i32
    return %arg0, %c0_i32 : i32, i32
  }
}

</mosaic_0001>

<bundles_post_ra>
// kernel: self_attention_batched.1
= control target key start
LH: loop header
LB: loop body
LE: loop exit
PB: predicated region body
PF: predicated region fallthrough
CT: control target
= control target key end

     0   :  { %s1738_s0 = inlined_call_operand.vmem [shape: bf16[128,128], index: 0, kind: input, shape index: {}]   ;;  %s1739_s1 = inlined_call_operand.vmem [shape: bf16[128,128], index: 1, kind: input, shape index: {}]   ;;  %s1740_s2 = inlined_call_operand.vmem [shape: f32[1,128], index: 2, kind: input, shape index: {}]   ;;  %s1741_s3 = inlined_call_operand.vmem [shape: f32[1,128], index: 3, kind: input, shape index: {}]   ;;  %s1742_s4 = inlined_call_operand.hbm [shape: f32[16,128], index: 4, kind: output, shape index: {}]  }
   0x1   :  { %v1174_v0 = vld [vmem:[%s1739_s1] sm:$0xff]   ;;  %v1175_v1 = vld [vmem:[%s1739_s1 + $0x8] sm:$0xff]   ;;  %v1176_v2 = vld [vmem:[%s1739_s1 + $0x10] sm:$0xff]  }
   0x2   :  { %1120 = vmatprep.subr.bf16.mxu0 %v1174_v0  ;;  %1152 = vmatprep.subr.bf16.mxu1 %v1174_v0  ;;  %v1177_v3 = vld [vmem:[%s1739_s1 + $0x18] sm:$0xff]   ;;  %v1182_v4 = vld [vmem:[%s1738_s0] sm:$0xff]   ;;  %v1179_v7 = vld [vmem:[%s1739_s1 + $0x28] sm:$0xff]  }
   0x3   :  { %1121 = vmatpush3.bf16.msra.mxu0 %v1174_v0  ;;  %1160 = vmatpush3.bf16.msra.mxu1 %v1174_v0  ;;  %v1183_v5 = vld [vmem:[%s1738_s0 + $0x20] sm:$0xff]  }
   0x4   :  { %1122 = vmatprep.subr.bf16.mxu0 %v1175_v1  ;;  %1153 = vmatprep.subr.bf16.mxu1 %v1175_v1  ;;  %v1178_v6 = vld [vmem:[%s1739_s1 + $0x20] sm:$0xff]  }
   0x5   :  { %1136 = vmatprep.mubr.bf16.mxu0 %v1182_v4  ;;  %1144 = vmatprep.mubr.bf16.mxu1 %v1183_v5 }
   0x7   :  { %1123 = vmatpush3.bf16.msra.mxu0 %v1175_v1  ;;  %1161 = vmatpush3.bf16.msra.mxu1 %v1175_v1 }
   0x8   :  { %1124 = vmatprep.subr.bf16.mxu0 %v1176_v2  ;;  %1154 = vmatprep.subr.bf16.mxu1 %v1176_v2 }
   0xb   :  { %1125 = vmatpush3.bf16.msra.mxu0 %v1176_v2  ;;  %1162 = vmatpush3.bf16.msra.mxu1 %v1176_v2 }
   0xc   :  { %1126 = vmatprep.subr.bf16.mxu0 %v1177_v3  ;;  %1155 = vmatprep.subr.bf16.mxu1 %v1177_v3 }
   0xf   :  { %1127 = vmatpush3.bf16.msra.mxu0 %v1177_v3  ;;  %1163 = vmatpush3.bf16.msra.mxu1 %v1177_v3 }
  0x10   :  { %1128 = vmatprep.subr.bf16.mxu0 %v1178_v6  ;;  %1156 = vmatprep.subr.bf16.mxu1 %v1178_v6 }
  0x11   :  { %9 = vsyncpa [#allocation3], 0  ;;  %v1180_v8 = vld [vmem:[%s1739_s1 + $0x30] sm:$0xff]   ;;  %v1181_v9 = vld [vmem:[%s1739_s1 + $0x38] sm:$0xff]   ;;  %vm420_vm0 = vcmask 1041409   ;;  %vm422_vm1 = vcmask 1042434  }
  0x12   :  { %v1184_v10 = vld [vmem:[%s1738_s0 + $0x8] sm:$0xff]   ;;  %v1186_v12 = vld [vmem:[%s1738_s0 + $0x10] sm:$0xff]   ;;  %v1187_v14 = vld [vmem:[%s1738_s0 + $0x18] sm:$0xff]   ;;  %vm424_vm2 = vcmask 1043459   ;;  %vm426_vm3 = vcmask 1044484   ;;  %vm428_vm4 = vcmask 1045509  }
  0x13   :  { %1129 = vmatpush3.bf16.msra.mxu0 %v1178_v6  ;;  %1164 = vmatpush3.bf16.msra.mxu1 %v1178_v6  ;;  %v1185_v11 = vld [vmem:[%s1738_s0 + $0x28] sm:$0xff]   ;;  %v1188_v13 = vld [vmem:[%s1738_s0 + $0x30] sm:$0xff]   ;;  %v1189_v15 = vld [vmem:[%s1738_s0 + $0x38] sm:$0xff]   ;;  %vm430_vm5 = vcmask 1046534   ;;  %vm432_vm6 = vcmask 1047559   ;;  %vm443_vm7 = vcmask 64512  }
  0x14   :  { %1130 = vmatprep.subr.bf16.mxu0 %v1179_v7  ;;  %1157 = vmatprep.subr.bf16.mxu1 %v1179_v7  ;;  %v1358_v16 = vld [vmem:[%s1740_s2] ss:$0 sm:$0xff] }
  0x15   :  { %v1369_v35 = vld [vmem:[%s1741_s3] ss:$0 sm:$0xff]  ;;  %s1279_s3 = smov [#allocation2]  }
  0x16   :  { %s1075_s22 = sshll.u32 %s1279_s3, 4  ;;  %s1076_s22 = int_to_ptr.vmem [resolvable:$true] %s1075_s22 }
  0x17   :  { %1131 = vmatpush3.bf16.msra.mxu0 %v1179_v7  ;;  %1165 = vmatpush3.bf16.msra.mxu1 %v1179_v7  ;;  %s1254_s23 = scalar_lea.vmem %s1076_s22, 256  ;;  %p1259_p1 = scmp.lt.s32.totalorder %s1076_s22, %s1076_s22 }
  0x18   :  { %1132 = vmatprep.subr.bf16.mxu0 %v1180_v8  ;;  %1158 = vmatprep.subr.bf16.mxu1 %v1180_v8  ;;  %p1255_p0 = scmp.ne.s32.totalorder %s1076_s22, %s1254_s23  ;;  %p1260_p2 = scmp.lt.s32.totalorder %s1254_s23, %s1254_s23 }
  0x1a   :  { %p1261_p3 = por %p1260_p2, %p1259_p1 }
  0x1b   :  { %1133 = vmatpush3.bf16.msra.mxu0 %v1180_v8  ;;  %1166 = vmatpush3.bf16.msra.mxu1 %v1180_v8 }
  0x1c   :  { %1134 = vmatprep.subr.bf16.mxu0 %v1181_v9  ;;  %1159 = vmatprep.subr.bf16.mxu1 %v1181_v9  ;;  %p1262_p4 = pnand %p1261_p3, %p1255_p0 }
  0x1f   :  { %1135 = vmatpush3.bf16.msra.mxu0 %v1181_v9  ;;  %1167 = vmatpush3.bf16.msra.mxu1 %v1181_v9 }
  0x22   :  { %1137 = vmatmul.mubr.bf16.vlgmr.msra.gmra.mrb[0].mxu0 %v1184_v10  ;;  %1145 = vmatmul.mubr.bf16.vlgmr.msra.gmra.mrb[0].mxu1 %v1185_v11 }
  0x23   :  { %1140 = vmatprep.mubr.bf16.mxu0 %v1186_v12  ;;  %1148 = vmatprep.mubr.bf16.mxu1 %v1188_v13 }
  0x2a   :  { %1141 = vmatmul.mubr.bf16.gmra.mrb[4].mxu0 %v1187_v14  ;;  %1149 = vmatmul.mubr.bf16.gmra.mrb[4].mxu1 %v1189_v15 }
  0xf5   :  { %v1138_v17 = vpop.f32.mrb[0].mxu0  ;;  %v1146_v18 = vpop.f32.mrb[0].mxu1 }
  0xf6   :  { %v197_v19 = vadd.f32 %v1138_v17, %v1358_v16  ;;  %v229_v20 = vadd.f32 %v1146_v18, %v1358_v16  ;;  %v188_v21 = vpop.f32.mrb[1].mxu0  ;;  %v220_v22 = vpop.f32.mrb[1].mxu1 }
  0xf7   :  { %v189_v23 = vadd.f32 %v1358_v16, %v188_v21  ;;  %v221_v24 = vadd.f32 %v1358_v16, %v220_v22  ;;  %v1139_v25 = vpop.f32.mrb[2].mxu0  ;;  %v1147_v26 = vpop.f32.mrb[2].mxu1 }
  0xf8   :  { %v253_v27 = vmul.f32 0.2, %v197_v19  ;;  %v261_v28 = vmul.f32 0.2, %v229_v20  ;;  %v200_v29 = vadd.f32 %v1139_v25, %v1358_v16  ;;  %v232_v30 = vadd.f32 %v1147_v26, %v1358_v16  ;;  %v191_v31 = vpop.f32.mrb[3].mxu0  ;;  %v223_v32 = vpop.f32.mrb[3].mxu1 }
  0xf9   :  { %v251_v33 = vmul.f32 0.2, %v189_v23  ;;  %v259_v34 = vmul.f32 0.2, %v221_v24  ;;  %v192_v40 = vadd.f32 %v1358_v16, %v191_v31  ;;  %v224_v41 = vadd.f32 %v1358_v16, %v223_v32 }
  0xfa   :  { %v1371_v36 = vmax.f32 %v229_v20, %v261_v28  ;;  %v1373_v37 = vmax.f32 %v197_v19, %v253_v27  ;;  %v254_v38 = vmul.f32 0.2, %v200_v29  ;;  %v262_v39 = vmul.f32 0.2, %v232_v30 }
  0xfb   :  { %v1377_v42 = vmax.f32 %v189_v23, %v251_v33  ;;  %v1379_v43 = vmax.f32 %v221_v24, %v259_v34  ;;  %v252_v52 = vmul.f32 0.2, %v192_v40  ;;  %v260_v53 = vmul.f32 0.2, %v224_v41 }
  0xfc   :  { %v300_v44 = vmul.f32 %v1369_v35, %v1371_v36  ;;  %v292_v45 = vmul.f32 %v1369_v35, %v1373_v37  ;;  %v1386_v51 = vmax.f32 %v200_v29, %v254_v38  ;;  %v1388_v56 = vmax.f32 %v232_v30, %v262_v39 }
  0xfd   :  { %v1142_v46 = vpop.f32.mrb[4].mxu0  ;;  %v1150_v47 = vpop.f32.mrb[4].mxu1  ;;  %v298_v58 = vmul.f32 %v1369_v35, %v1379_v43  ;;  %v290_v59 = vmul.f32 %v1369_v35, %v1377_v42  ;;  %v1395_v63 = vmax.f32 %v192_v40, %v252_v52  ;;  %v1397_v0 = vmax.f32 %v224_v41, %v260_v53 }
  0xfe   :  { %326 = vadd.xlane.f32.xlu1 %v300_v44  ;;  %310 = vadd.xlane.f32.xlu0 %v292_v45  ;;  %v204_v48 = vpop.f32.mrb[5].mxu0  ;;  %v245_v49 = vadd.f32 %v1150_v47, %v1358_v16  ;;  %v236_v50 = vpop.f32.mrb[5].mxu1  ;;  %v213_v57 = vadd.f32 %v1142_v46, %v1358_v16  ;;  %v301_v4 = vmul.f32 %v1369_v35, %v1388_v56  ;;  %v354_v41 = vlaneseq }
  0xff   :  { %v1143_v54 = vpop.f32.mrb[6].mxu0  ;;  %v1151_v55 = vpop.f32.mrb[6].mxu1  ;;  %v205_v1 = vadd.f32 %v1358_v16, %v204_v48  ;;  %v237_v3 = vadd.f32 %v1358_v16, %v236_v50  ;;  %v293_v5 = vmul.f32 %v1369_v35, %v1386_v51  ;;  %v299_v9 = vmul.f32 %v1369_v35, %v1397_v0 }
 0x100   :  { %v207_v60 = vpop.f32.mrb[7].mxu0  ;;  %v239_v61 = vpop.f32.mrb[7].mxu1  ;;  %v265_v62 = vmul.f32 0.2, %v245_v49  ;;  %v257_v2 = vmul.f32 0.2, %v213_v57  ;;  %v291_v13 = vmul.f32 %v1369_v35, %v1395_v63  ;;  %v216_v17 = vadd.f32 %v1143_v54, %v1358_v16 }
 0x101   :  { %v255_v7 = vmul.f32 0.2, %v205_v1  ;;  %v208_v8 = vadd.f32 %v1358_v16, %v207_v60  ;;  %v263_v11 = vmul.f32 0.2, %v237_v3  ;;  %v240_v12 = vadd.f32 %v1358_v16, %v239_v61 }
 0x102   :  { %322 = vadd.xlane.f32.xlu1 %v298_v58  ;;  %306 = vadd.xlane.f32.xlu0 %v290_v59  ;;  %v1405_v6 = vmax.f32 %v245_v49, %v265_v62  ;;  %v1410_v10 = vmax.f32 %v213_v57, %v257_v2  ;;  %v248_v18 = vadd.f32 %v1151_v55, %v1358_v16  ;;  %v258_v23 = vmul.f32 0.2, %v216_v17 }
 0x103   :  { %v1417_v15 = vmax.f32 %v205_v1, %v255_v7  ;;  %v256_v19 = vmul.f32 0.2, %v208_v8  ;;  %v1421_v20 = vmax.f32 %v237_v3, %v263_v11  ;;  %v264_v21 = vmul.f32 0.2, %v240_v12 }
 0x104   :  { %v304_v14 = vmul.f32 %v1369_v35, %v1405_v6  ;;  %v296_v22 = vmul.f32 %v1369_v35, %v1410_v10  ;;  %v266_v24 = vmul.f32 0.2, %v248_v18  ;;  %v1433_v28 = vmax.f32 %v216_v17, %v258_v23 }
 0x105   :  { %v1425_v25 = vmax.f32 %v208_v8, %v256_v19  ;;  %v1427_v26 = vmax.f32 %v240_v12, %v264_v21  ;;  %v302_v27 = vmul.f32 %v1369_v35, %v1421_v20  ;;  %v294_v16 = vmul.f32 %v1369_v35, %v1417_v15 }
 0x106   :  { %328 = vadd.xlane.f32.xlu1 %v301_v4  ;;  %312 = vadd.xlane.f32.xlu0 %v293_v5  ;;  %v1435_v29 = vmax.f32 %v248_v18, %v266_v24  ;;  %v297_v33 = vmul.f32 %v1369_v35, %v1433_v28  ;;  %v355_v46 = vand.u32 127, %v354_v41  ;;  %v1457_v47 = vshrl.u32 %v354_v41, 7 }
 0x107   :  { %v303_v30 = vmul.f32 %v1369_v35, %v1427_v26  ;;  %v295_v31 = vmul.f32 %v1369_v35, %v1425_v25 }
 0x108   :  { %v305_v32 = vmul.f32 %v1369_v35, %v1435_v29  ;;  %v1464_v49 = vsub.s32 %v355_v46, %v1457_v47 }
 0x10a   :  { %324 = vadd.xlane.f32.xlu1 %v299_v9  ;;  %308 = vadd.xlane.f32.xlu0 %v291_v13 }
 0x10e   :  { %334 = vadd.xlane.f32.xlu1 %v304_v14  ;;  %318 = vadd.xlane.f32.xlu0 %v296_v22 }
 0x112   :  { %330 = vadd.xlane.f32.xlu1 %v302_v27  ;;  %314 = vadd.xlane.f32.xlu0 %v294_v16 }
 0x116   :  { %332 = vadd.xlane.f32.xlu1 %v303_v30  ;;  %316 = vadd.xlane.f32.xlu0 %v295_v31 }
 0x11a   :  { %336 = vadd.xlane.f32.xlu1 %v305_v32  ;;  %320 = vadd.xlane.f32.xlu0 %v297_v33 }
 0x18b   :  { %v1445_v34 = vpop.xlane.xlu1 %326  ;;  %v1447_v38 = vpop.xlane.xlu0 %310 }
 0x18c   :  { %v399_v60 = vrot.slane %v1445_v34, %v1464_v49  ;;  %v367_v61 = vrot.slane %v1447_v38, %v1464_v49 }
 0x18f   :  { %v1449_v39 = vpop.xlane.xlu1 %322  ;;  %v1451_v40 = vpop.xlane.xlu0 %306 }
 0x190   :  { %v391_v55 = vrot.slane %v1449_v39, %v1464_v49  ;;  %v359_v57 = vrot.slane %v1451_v40, %v1464_v49 }
 0x193   :  { %v1453_v44 = vpop.xlane.xlu1 %328  ;;  %v1455_v45 = vpop.xlane.xlu0 %312 }
 0x194   :  { %v403_v7 = vrot.slane %v1453_v44, %v1464_v49  ;;  %v371_v8 = vrot.slane %v1455_v45, %v1464_v49 }
 0x197   :  { %v1459_v48 = vpop.xlane.xlu1 %324  ;;  %v1461_v35 = vpop.xlane.xlu0 %308 }
 0x198   :  { %v395_v50 = vrot.slane %v1459_v48, %v1464_v49  ;;  %v363_v52 = vrot.slane %v1461_v35, %v1464_v49 }
 0x19a   :  { %v434_v58 = vsel %vm420_vm0, %v395_v50, %v391_v55  ;;  %v421_v59 = vsel %vm420_vm0, %v363_v52, %v359_v57  ;;  %v1278_v55 = vmov 0   ;;  %v1522_v57 = vsub.s32 0, %v1457_v47 }
 0x19b   :  { %v1470_v53 = vpop.xlane.xlu1 %334  ;;  %v1472_v54 = vpop.xlane.xlu0 %318  ;;  %v435_v2 = vsel %vm422_vm1, %v399_v60, %v434_v58  ;;  %v423_v3 = vsel %vm422_vm1, %v367_v61, %v421_v59  ;;  %1173 = vset.pattern.permute.xlu1 %v1278_v55  ;;  %1172 = vset.pattern.permute.xlu0 %v1278_v55  ;;  %v1525_v58 = vsub.s32 1, %v1457_v47  ;;  %v1530_v60 = vsub.s32 4, %v1457_v47 }
 0x19c   :  { %v436_v12 = vsel %vm424_vm2, %v403_v7, %v435_v2  ;;  %v425_v13 = vsel %vm424_vm2, %v371_v8, %v423_v3  ;;  %v415_v23 = vrot.slane %v1470_v53, %v1464_v49  ;;  %v383_v24 = vrot.slane %v1472_v54, %v1464_v49 }
 0x19f   :  { %v331_v62 = vpop.xlane.xlu1 %330  ;;  %v1484_v1 = vpop.xlane.xlu0 %314 }
 0x1a0   :  { %v407_v4 = vrot.slane %v331_v62, %v1464_v49  ;;  %v375_v5 = vrot.slane %v1484_v1, %v1464_v49 }
 0x1a2   :  { %v437_v18 = vsel %vm426_vm3, %v407_v4, %v436_v12  ;;  %v427_v19 = vsel %vm426_vm3, %v375_v5, %v425_v13  ;;  %v1537_v4 = vsub.s32 5, %v1457_v47  ;;  %v1544_v13 = vsub.s32 2, %v1457_v47 }
 0x1a3   :  { %v333_v9 = vpop.xlane.xlu1 %332  ;;  %v1495_v11 = vpop.xlane.xlu0 %316 }
 0x1a4   :  { %v411_v14 = vrot.slane %v333_v9, %v1464_v49  ;;  %v379_v17 = vrot.slane %v1495_v11, %v1464_v49 }
 0x1a6   :  { %v438_v21 = vsel %vm428_vm4, %v411_v14, %v437_v18  ;;  %v429_v22 = vsel %vm428_vm4, %v379_v17, %v427_v19  ;;  %v1547_v14 = vsub.s32 6, %v1457_v47 }
 0x1a7   :  { %v337_v27 = vpop.xlane.xlu1 %336  ;;  %v1510_v16 = vpop.xlane.xlu0 %320  ;;  %v439_v32 = vsel %vm430_vm5, %v415_v23, %v438_v21  ;;  %v431_v33 = vsel %vm430_vm5, %v383_v24, %v429_v22  ;;  %v1553_v24 = vsub.s32 7, %v1457_v47 }
 0x1a8   :  { %v419_v30 = vrot.slane %v337_v27, %v1464_v49  ;;  %v387_v31 = vrot.slane %v1510_v16, %v1464_v49 }
 0x1aa   :  { %v440_v41 = vsel %vm432_vm6, %v419_v30, %v439_v32  ;;  %v433_v46 = vsel %vm432_vm6, %v387_v31, %v431_v33  ;;  %v1560_v33 = vsub.s32 3, %v1457_v47 }
 0x1ab   :  { %v447_v50 = vsel %vm443_vm7, %v440_v41, -inf  ;;  %v444_v52 = vsel %vm443_vm7, %v433_v46, -inf }
 0x1ac   :  { %448 = vmax.xlane.f32.xlu1 %v447_v50  ;;  %445 = vmax.xlane.f32.xlu0 %v444_v52 }
 0x239   :  { %v1527_v59 = vpop.xlane.xlu0 %445  ;;  %v449_v61 = vpop.xlane.xlu1 %448 }
 0x23a   :  { %v455_v2 = vrot.slane %v1527_v59, %v1522_v57  ;;  %v459_v3 = vrot.slane %v1527_v59, %v1525_v58  ;;  %v503_v5 = vrot.slane %v449_v61, %v1530_v60  ;;  %v487_v7 = vrot.slane %v449_v61, %v1522_v57 }
 0x23b   :  { %v507_v17 = vrot.slane %v449_v61, %v1537_v4  ;;  %v491_v19 = vrot.slane %v449_v61, %v1525_v58  ;;  %v467_v47 = vrot.slane %v1527_v59, %v1560_v33 }
 0x23c   :  { %v532_v8 = vsub.f32 %v1451_v40, %v455_v2  ;;  %v533_v12 = vsub.f32 %v1461_v35, %v459_v3  ;;  %v544_v18 = vsub.f32 %v331_v62, %v503_v5  ;;  %v540_v21 = vsub.f32 %v1449_v39, %v487_v7 }
 0x23d   :  { %v511_v40 = vrot.slane %v449_v61, %v1547_v14  ;;  %v545_v35 = vsub.f32 %v333_v9, %v507_v17  ;;  %v541_v31 = vsub.f32 %v1459_v48, %v491_v19  ;;  %v463_v62 = vrot.slane %v1527_v59, %v1544_v13 }
 0x23e   :  { %v548_v22 = vmul.f32 1.442695, %v532_v8  ;;  %v550_v23 = vmul.f32 1.442695, %v533_v12  ;;  %v572_v30 = vmul.f32 1.442695, %v544_v18  ;;  %v515_v39 = vrot.slane %v449_v61, %v1553_v24 }
 0x23f   :  { %v564_v32 = vmul.f32 1.442695, %v540_v21  ;;  %v546_v41 = vsub.f32 %v1470_v53, %v511_v40  ;;  %v574_v46 = vmul.f32 1.442695, %v545_v35  ;;  %v495_v9 = vrot.slane %v449_v61, %v1544_v13 }
 0x240   :  { %1190 = vpow2.f32 %v548_v22  ;;  %v566_v50 = vmul.f32 1.442695, %v541_v31  ;;  %v534_v48 = vsub.f32 %v1447_v38, %v463_v62  ;;  %v547_v52 = vsub.f32 %v337_v27, %v515_v39 }
 0x241   :  { %1192 = vpow2.f32 %v550_v23  ;;  %v576_v55 = vmul.f32 1.442695, %v546_v41  ;;  %v542_v2 = vsub.f32 %v1445_v34, %v495_v9  ;;  %v499_v38 = vrot.slane %v449_v61, %v1560_v33 }
 0x242   :  { %1194 = vpow2.f32 %v572_v30  ;;  %v552_v3 = vmul.f32 1.442695, %v534_v48  ;;  %v578_v7 = vmul.f32 1.442695, %v547_v52  ;;  %v535_v34 = vsub.f32 %v1455_v45, %v467_v47 }
 0x243   :  { %1196 = vpow2.f32 %v564_v32  ;;  %v568_v27 = vmul.f32 1.442695, %v542_v2  ;;  %v543_v17 = vsub.f32 %v1453_v44, %v499_v38  ;;  %v471_v18 = vrot.slane %v1527_v59, %v1530_v60 }
 0x244   :  { %1198 = vpow2.f32 %v574_v46  ;;  %v554_v61 = vmul.f32 1.442695, %v535_v34  ;;  %v475_v22 = vrot.slane %v1527_v59, %v1537_v4  ;;  %v479_v35 = vrot.slane %v1527_v59, %v1547_v14 }
 0x245   :  { %1200 = vpow2.f32 %v566_v50  ;;  %v570_v21 = vmul.f32 1.442695, %v543_v17  ;;  %v536_v23 = vsub.f32 %v1484_v1, %v471_v18  ;;  %v483_v1 = vrot.slane %v1527_v59, %v1553_v24 }
 0x246   :  { %1202 = vpow2.f32 %v576_v55  ;;  %v537_v30 = vsub.f32 %v1495_v11, %v475_v22  ;;  %v538_v39 = vsub.f32 %v1472_v54, %v479_v35 }
 0x247   :  { %1204 = vpow2.f32 %v552_v3  ;;  %v556_v31 = vmul.f32 1.442695, %v536_v23  ;;  %v539_v11 = vsub.f32 %v1510_v16, %v483_v1 }
 0x248   :  { %1206 = vpow2.f32 %v578_v7  ;;  %v558_v41 = vmul.f32 1.442695, %v537_v30  ;;  %v560_v9 = vmul.f32 1.442695, %v538_v39 }
 0x249   :  { %1208 = vpow2.f32 %v568_v27  ;;  %v562_v48 = vmul.f32 1.442695, %v539_v11 }
 0x24a   :  { %v1569_v5 = vpop.eup %1190  ;;  %1210 = vpow2.f32 %v554_v61 }
 0x24b   :  { %v1571_v53 = vpop.eup %1192  ;;  %597 = vperm.xlu0 %1172, %v1569_v5   ;;  %1212 = vpow2.f32 %v570_v21 }
 0x24c   :  { %600 = vperm.xlu1 %1173, %v1571_v53   ;;  %v1577_v8 = vpop.eup %1194  ;;  %1214 = vpow2.f32 %v556_v31 }
 0x24d   :  { %v1579_v12 = vpop.eup %1196  ;;  %1216 = vpow2.f32 %v558_v41 }
 0x24e   :  { %v1586_v19 = vpop.eup %1198  ;;  %1218 = vpow2.f32 %v560_v9 }
 0x24f   :  { %633 = vperm.xlu0 %1172, %v1577_v8   ;;  %v1588_v45 = vpop.eup %1200  ;;  %1220 = vpow2.f32 %v562_v48 }
 0x250   :  { %621 = vperm.xlu1 %1173, %v1579_v12   ;;  %v1595_v44 = vpop.eup %1202 }
 0x251   :  { %v1597_v40 = vpop.eup %1204 }
 0x252   :  { %v1604_v32 = vpop.eup %1206 }
 0x253   :  { %636 = vperm.xlu0 %1172, %v1586_v19   ;;  %v1606_v62 = vpop.eup %1208 }
 0x254   :  { %624 = vperm.xlu1 %1173, %v1588_v45   ;;  %v1613_v46 = vpop.eup %1210 }
 0x255   :  { %v1617_v50 = vpop.eup %1212 }
 0x256   :  { %v1620_v52 = vpop.eup %1214 }
 0x257   :  { %639 = vperm.xlu0 %1172, %v1595_v44   ;;  %v1623_v54 = vpop.eup %1216 }
 0x258   :  { %603 = vperm.xlu1 %1173, %v1597_v40   ;;  %v1626_v59 = vpop.eup %1218 }
 0x259   :  { %v1629_v16 = vpop.eup %1220 }
 0x25b   :  { %642 = vperm.xlu0 %1172, %v1604_v32  }
 0x25c   :  { %627 = vperm.xlu1 %1173, %v1606_v62  }
 0x260   :  { %606 = vperm.xlu1 %1173, %v1613_v46  }
 0x264   :  { %630 = vperm.xlu1 %1173, %v1617_v50  }
 0x268   :  { %609 = vperm.xlu1 %1173, %v1620_v52  }
 0x26c   :  { %612 = vperm.xlu1 %1173, %v1623_v54  }
 0x270   :  { %615 = vperm.xlu1 %1173, %v1626_v59  }
 0x274   :  { %618 = vperm.xlu1 %1173, %v1629_v16  }
 0x2ca   :  { %v598_v2 = vpop.permute.xlu0 %597 }
 0x2cb   :  { %v601_v55 = vpop.permute.xlu1 %600 }
 0x2ce   :  { %v634_v3 = vpop.permute.xlu0 %633 }
 0x2cf   :  { %v622_v47 = vpop.permute.xlu1 %621  ;;  %v695_v31 = vrot.slane %v634_v3, %v1464_v49 }
 0x2d0   :  { %v679_v22 = vrot.slane %v622_v47, %v1464_v49 }
 0x2d2   :  { %v637_v27 = vpop.permute.xlu0 %636 }
 0x2d3   :  { %v625_v7 = vpop.permute.xlu1 %624  ;;  %v699_v41 = vrot.slane %v637_v27, %v1464_v49  ;;  %v651_v27 = vrot.slane %v601_v55, %v1464_v49 }
 0x2d4   :  { %v683_v61 = vrot.slane %v625_v7, %v1464_v49 }
 0x2d6   :  { %v640_v17 = vpop.permute.xlu0 %639  ;;  %v715_v35 = vsel %vm420_vm0, %v683_v61, %v679_v22 }
 0x2d7   :  { %v604_v38 = vpop.permute.xlu1 %603  ;;  %v703_v9 = vrot.slane %v640_v17, %v1464_v49 }
 0x2d8   :  { %v655_v17 = vrot.slane %v604_v38, %v1464_v49 }
 0x2da   :  { %v643_v39 = vpop.permute.xlu0 %642 }
 0x2db   :  { %v628_v34 = vpop.permute.xlu1 %627  ;;  %v707_v47 = vrot.slane %v643_v39, %v1464_v49 }
 0x2dc   :  { %v687_v21 = vrot.slane %v628_v34, %v1464_v49 }
 0x2de   :  { %v716_v1 = vsel %vm422_vm1, %v687_v21, %v715_v35 }
 0x2df   :  { %v607_v18 = vpop.permute.xlu1 %606 }
 0x2e0   :  { %v659_v35 = vrot.slane %v607_v18, %v1464_v49 }
 0x2e3   :  { %v631_v23 = vpop.permute.xlu1 %630 }
 0x2e4   :  { %v691_v30 = vrot.slane %v631_v23, %v1464_v49  ;;  %v647_v23 = vrot.slane %v598_v2, %v1464_v49 }
 0x2e6   :  { %v717_v11 = vsel %vm424_vm2, %v691_v30, %v716_v1  ;;  %v708_v1 = vsel %vm420_vm0, %v651_v27, %v647_v23 }
 0x2e7   :  { %v718_v48 = vsel %vm426_vm3, %v695_v31, %v717_v11  ;;  %v610_v7 = vpop.permute.xlu1 %609 }
 0x2e8   :  { %v719_v34 = vsel %vm428_vm4, %v699_v41, %v718_v48  ;;  %v663_v30 = vrot.slane %v610_v7, %v1464_v49  ;;  %v709_v41 = vsel %vm422_vm1, %v655_v17, %v708_v1 }
 0x2e9   :  { %v720_v61 = vsel %vm430_vm5, %v703_v9, %v719_v34  ;;  %v710_v55 = vsel %vm424_vm2, %v659_v35, %v709_v41 }
 0x2ea   :  { %v721_v3 = vsel %vm432_vm6, %v707_v47, %v720_v61  ;;  %v711_v2 = vsel %vm426_vm3, %v663_v30, %v710_v55 }
 0x2eb   :  { %v613_v22 = vpop.permute.xlu1 %612  ;;  %v727_v21 = vsel %vm443_vm7, %v721_v3, 0.0 }
 0x2ec   :  { %728 = vadd.xlane.f32.xlu0 %v727_v21  ;;  %v667_v39 = vrot.slane %v613_v22, %v1464_v49 }
 0x2ee   :  { %v712_v38 = vsel %vm428_vm4, %v667_v39, %v711_v2 }
 0x2ef   :  { %v616_v31 = vpop.permute.xlu1 %615 }
 0x2f0   :  { %v671_v11 = vrot.slane %v616_v31, %v1464_v49 }
 0x2f2   :  { %v713_v48 = vsel %vm430_vm5, %v671_v11, %v712_v38 }
 0x2f3   :  { %v619_v9 = vpop.permute.xlu1 %618 }
 0x2f4   :  { %v675_v18 = vrot.slane %v619_v9, %v1464_v49 }
 0x2f6   :  { %v714_v7 = vsel %vm432_vm6, %v675_v18, %v713_v48 }
 0x2f7   :  { %v724_v47 = vsel %vm443_vm7, %v714_v7, 0.0 }
 0x2f8   :  { %725 = vadd.xlane.f32.xlu1 %v724_v47 }
 0x379   :  { %v729_v34 = vpop.xlane.xlu0 %728 }
 0x37a   :  { %v767_v21 = vrot.slane %v729_v34, %v1522_v57  ;;  %v771_v27 = vrot.slane %v729_v34, %v1525_v58  ;;  %v775_v23 = vrot.slane %v729_v34, %v1544_v13  ;;  %v779_v35 = vrot.slane %v729_v34, %v1560_v33 }
 0x37b   :  { %v783_v1 = vrot.slane %v729_v34, %v1530_v60  ;;  %v787_v55 = vrot.slane %v729_v34, %v1537_v4  ;;  %v791_v38 = vrot.slane %v729_v34, %v1547_v14  ;;  %v795_v7 = vrot.slane %v729_v34, %v1553_v24 }
 0x385   :  { %v726_v61 = vpop.xlane.xlu1 %725 }
 0x386   :  { %v739_v3 = vrot.slane %v726_v61, %v1525_v58  ;;  %v735_v22 = vrot.slane %v726_v61, %v1522_v57  ;;  %v743_v49 = vrot.slane %v726_v61, %v1544_v13  ;;  %v747_v17 = vrot.slane %v726_v61, %v1560_v33 }
 0x387   :  { %v751_v57 = vrot.slane %v726_v61, %v1530_v60  ;;  %v755_v11 = vrot.slane %v726_v61, %v1537_v4  ;;  %v759_v60 = vrot.slane %v726_v61, %v1547_v14  ;;  %v763_v4 = vrot.slane %v726_v61, %v1553_v24 }
 0x388   :  { %1222 = vrcp.f32 %v739_v3 }
 0x389   :  { %1224 = vrcp.f32 %v735_v22 }
 0x38a   :  { %1226 = vrcp.f32 %v767_v21 }
 0x38b   :  { %1228 = vrcp.f32 %v771_v27 }
 0x38c   :  { %1230 = vrcp.f32 %v743_v49 }
 0x38d   :  { %1232 = vrcp.f32 %v775_v23 }
 0x38e   :  { %1234 = vrcp.f32 %v747_v17 }
 0x38f   :  { %1236 = vrcp.f32 %v779_v35 }
 0x390   :  { %1238 = vrcp.f32 %v751_v57 }
 0x391   :  { %1240 = vrcp.f32 %v783_v1 }
 0x392   :  { %v1223_v30 = vpop.eup %1222  ;;  %1242 = vrcp.f32 %v755_v11 }
 0x393   :  { %v1225_v31 = vpop.eup %1224  ;;  %v815_v58 = vmul.f32 %v1223_v30, %v1571_v53  ;;  %1244 = vrcp.f32 %v787_v55 }
 0x394   :  { %v1227_v39 = vpop.eup %1226  ;;  %v813_v41 = vmul.f32 %v1225_v31, %v1569_v5  ;;  %1246 = vrcp.f32 %v759_v60 }
 0x395   :  { %v1229_v13 = vpop.eup %1228  ;;  %851 = vperm.xlu1 %1173, %v815_v58   ;;  %v829_v33 = vmul.f32 %v1227_v39, %v1579_v12  ;;  %1248 = vrcp.f32 %v791_v38 }
 0x396   :  { %846 = vperm.xlu0 %1172, %v813_v41   ;;  %v1231_v2 = vpop.eup %1230  ;;  %v831_v53 = vmul.f32 %v1229_v13, %v1588_v45  ;;  %1250 = vrcp.f32 %v763_v4 }
 0x397   :  { %v1233_v9 = vpop.eup %1232  ;;  %v817_v5 = vmul.f32 %v1231_v2, %v1597_v40  ;;  %1252 = vrcp.f32 %v795_v7 }
 0x398   :  { %v1235_v18 = vpop.eup %1234  ;;  %v833_v12 = vmul.f32 %v1233_v9, %v1606_v62 }
 0x399   :  { %886 = vperm.xlu1 %1173, %v829_v33   ;;  %v1237_v48 = vpop.eup %1236  ;;  %v819_v45 = vmul.f32 %v1235_v18, %v1613_v46 }
 0x39a   :  { %891 = vperm.xlu0 %1172, %v831_v53   ;;  %v1239_v47 = vpop.eup %1238  ;;  %v835_v40 = vmul.f32 %v1237_v48, %v1617_v50 }
 0x39b   :  { %v1241_v3 = vpop.eup %1240  ;;  %v821_v14 = vmul.f32 %v1239_v47, %v1620_v52 }
 0x39c   :  { %v1243_v62 = vpop.eup %1242  ;;  %v837_v22 = vmul.f32 %v1241_v3, %v1577_v8 }
 0x39d   :  { %856 = vperm.xlu1 %1173, %v817_v5   ;;  %v1245_v21 = vpop.eup %1244  ;;  %v823_v46 = vmul.f32 %v1243_v62, %v1623_v54 }
 0x39e   :  { %896 = vperm.xlu0 %1172, %v833_v12   ;;  %v1247_v61 = vpop.eup %1246  ;;  %v839_v24 = vmul.f32 %v1245_v21, %v1586_v19 }
 0x39f   :  { %v1249_v34 = vpop.eup %1248  ;;  %v825_v50 = vmul.f32 %v1247_v61, %v1626_v59 }
 0x3a0   :  { %v1251_v27 = vpop.eup %1250  ;;  %v841_v52 = vmul.f32 %v1249_v34, %v1595_v44 }
 0x3a1   :  { %861 = vperm.xlu1 %1173, %v819_v45   ;;  %v1253_v49 = vpop.eup %1252  ;;  %v827_v8 = vmul.f32 %v1251_v27, %v1629_v16 }
 0x3a2   :  { %901 = vperm.xlu0 %1172, %v835_v40   ;;  %v843_v23 = vmul.f32 %v1253_v49, %v1604_v32 }
 0x3a5   :  { %866 = vperm.xlu1 %1173, %v821_v14  }
 0x3a6   :  { %906 = vperm.xlu0 %1172, %v837_v22  }
 0x3a9   :  { %871 = vperm.xlu1 %1173, %v823_v46  }
 0x3aa   :  { %911 = vperm.xlu0 %1172, %v839_v24  }
 0x3ad   :  { %876 = vperm.xlu1 %1173, %v825_v50  }
 0x3ae   :  { %916 = vperm.xlu0 %1172, %v841_v52  }
 0x3b1   :  { %881 = vperm.xlu1 %1173, %v827_v8  }
 0x3b2   :  { %921 = vperm.xlu0 %1172, %v843_v23  }
 0x414   :  { %v852_v54 = vpop.permute.xlu1 %851 }
 0x415   :  { %v925_v19 = vmul.f32 %v852_v54, %v1395_v63  ;;  %v847_v17 = vpop.permute.xlu0 %846 }
 0x416   :  { %v924_v35 = vmul.f32 %v847_v17, %v1377_v42 }
 0x417   :  { %v946_v30 = vrot.slane %v925_v19, 4 }
 0x418   :  { %v940_v59 = vrot.slane %v924_v35, 4  ;;  %v887_v57 = vpop.permute.xlu1 %886 }
 0x419   :  { %v947_v31 = vadd.f32 %v946_v30, %v925_v19  ;;  %v932_v44 = vmul.f32 %v887_v57, %v1379_v43  ;;  %v892_v58 = vpop.permute.xlu0 %891 }
 0x41a   :  { %v941_v1 = vadd.f32 %v940_v59, %v924_v35  ;;  %v933_v16 = vmul.f32 %v892_v58, %v1397_v0 }
 0x41b   :  { %v988_v39 = vrot.slane %v932_v44, 4  ;;  %v948_v32 = vrot.slane %v947_v31, 2 }
 0x41c   :  { %v942_v41 = vrot.slane %v941_v1, 2  ;;  %v994_v13 = vrot.slane %v933_v16, 4  ;;  %v857_v11 = vpop.permute.xlu1 %856 }
 0x41d   :  { %v989_v33 = vadd.f32 %v988_v39, %v932_v44  ;;  %v897_v63 = vpop.permute.xlu0 %896  ;;  %v926_v42 = vmul.f32 %v857_v11, %v1373_v37  ;;  %v949_v53 = vadd.f32 %v948_v32, %v947_v31 }
 0x41e   :  { %v995_v55 = vadd.f32 %v994_v13, %v933_v16  ;;  %v934_v2 = vmul.f32 %v897_v63, %v1371_v36  ;;  %v943_v9 = vadd.f32 %v942_v41, %v941_v1 }
 0x41f   :  { %v990_v43 = vrot.slane %v989_v33, 2  ;;  %v952_v18 = vrot.slane %v926_v42, 4  ;;  %v950_v45 = vrot.slane %v949_v53, 1 }
 0x420   :  { %v862_v60 = vpop.permute.xlu1 %861  ;;  %v996_v0 = vrot.slane %v995_v55, 2  ;;  %v1000_v48 = vrot.slane %v934_v2, 4  ;;  %v944_v7 = vrot.slane %v943_v9, 1 }
 0x421   :  { %v927_v5 = vmul.f32 %v862_v60, %v1386_v51  ;;  %v902_v38 = vpop.permute.xlu0 %901  ;;  %v991_v37 = vadd.f32 %v990_v43, %v989_v33  ;;  %v953_v62 = vadd.f32 %v952_v18, %v926_v42  ;;  %v951_v61 = vadd.f32 %v950_v45, %v949_v53 }
 0x422   :  { %v935_v12 = vmul.f32 %v902_v38, %v1388_v56  ;;  %v997_v14 = vadd.f32 %v996_v0, %v995_v55  ;;  %v1001_v51 = vadd.f32 %v1000_v48, %v934_v2  ;;  %v945_v24 = vadd.f32 %v944_v7, %v943_v9 }
 0x423   :  { %v958_v4 = vrot.slane %v927_v5, 4  ;;  %v992_v27 = vrot.slane %v991_v37, 1 }
 0x424   :  { %v1006_v47 = vrot.slane %v935_v12, 4  ;;  %v867_v40 = vpop.permute.xlu1 %866  ;;  %v998_v23 = vrot.slane %v997_v14, 1  ;;  %v1002_v17 = vrot.slane %v1001_v51, 2  ;;  %v1052_v30 = vsel %vm420_vm0, %v951_v61, %v945_v24 }
 0x425   :  { %v928_v36 = vmul.f32 %v867_v40, %v1417_v15  ;;  %v907_v3 = vpop.permute.xlu0 %906  ;;  %v959_v21 = vadd.f32 %v958_v4, %v927_v5  ;;  %v954_v15 = vrot.slane %v953_v62, 2  ;;  %v993_v58 = vadd.f32 %v992_v27, %v991_v37 }
 0x426   :  { %v936_v22 = vmul.f32 %v907_v3, %v1421_v20  ;;  %v1007_v56 = vadd.f32 %v1006_v47, %v935_v12  ;;  %v999_v32 = vadd.f32 %v998_v23, %v997_v14  ;;  %v1003_v11 = vadd.f32 %v1002_v17, %v1001_v51 }
 0x427   :  { %v964_v46 = vrot.slane %v928_v36, 4  ;;  %v960_v20 = vrot.slane %v959_v21, 2  ;;  %v955_v41 = vadd.f32 %v954_v15, %v953_v62 }
 0x428   :  { %v1012_v34 = vrot.slane %v936_v22, 4  ;;  %v872_v50 = vpop.permute.xlu1 %871  ;;  %v1008_v59 = vrot.slane %v1007_v56, 2  ;;  %v1004_v4 = vrot.slane %v1003_v11, 1 }
 0x429   :  { %v965_v52 = vadd.f32 %v964_v46, %v928_v36  ;;  %v929_v49 = vmul.f32 %v872_v50, %v1425_v25  ;;  %v912_v8 = vpop.permute.xlu0 %911  ;;  %v961_v33 = vadd.f32 %v960_v20, %v959_v21  ;;  %v956_v18 = vrot.slane %v955_v41, 1 }
 0x42a   :  { %v1013_v54 = vadd.f32 %v1012_v34, %v936_v22  ;;  %v937_v19 = vmul.f32 %v912_v8, %v1427_v26  ;;  %v1009_v42 = vadd.f32 %v1008_v59, %v1007_v56  ;;  %v1005_v24 = vadd.f32 %v1004_v4, %v1003_v11 }
 0x42b   :  { %v970_v35 = vrot.slane %v929_v49, 4  ;;  %v966_v57 = vrot.slane %v965_v52, 2  ;;  %v962_v45 = vrot.slane %v961_v33, 1  ;;  %v957_v21 = vadd.f32 %v956_v18, %v955_v41 }
 0x42c   :  { %v1018_v31 = vrot.slane %v937_v19, 4  ;;  %v877_v44 = vpop.permute.xlu1 %876  ;;  %v1014_v1 = vrot.slane %v1013_v54, 2  ;;  %v1010_v40 = vrot.slane %v1009_v42, 1  ;;  %v1059_v8 = vsel %vm420_vm0, %v999_v32, %v993_v58 }
 0x42d   :  { %v971_v16 = vadd.f32 %v970_v35, %v929_v49  ;;  %v930_v25 = vmul.f32 %v877_v44, %v1410_v10  ;;  %v917_v39 = vpop.permute.xlu0 %916  ;;  %v967_v2 = vadd.f32 %v966_v57, %v965_v52  ;;  %v963_v56 = vadd.f32 %v962_v45, %v961_v33 }
 0x42e   :  { %v1019_v13 = vadd.f32 %v1018_v31, %v937_v19  ;;  %v938_v26 = vmul.f32 %v917_v39, %v1405_v6  ;;  %v1015_v43 = vadd.f32 %v1014_v1, %v1013_v54  ;;  %v1011_v50 = vadd.f32 %v1010_v40, %v1009_v42 }
 0x42f   :  { %v972_v63 = vrot.slane %v971_v16, 2  ;;  %v976_v55 = vrot.slane %v930_v25, 4  ;;  %v968_v37 = vrot.slane %v967_v2, 1  ;;  %v1053_v19 = vsel %vm422_vm1, %v957_v21, %v1052_v30 }
 0x430   :  { %v1020_v53 = vrot.slane %v1019_v13, 2  ;;  %v1024_v9 = vrot.slane %v938_v26, 4  ;;  %v882_v60 = vpop.permute.xlu1 %881  ;;  %v1016_v14 = vrot.slane %v1015_v43, 1  ;;  %v1060_v59 = vsel %vm422_vm1, %v1005_v24, %v1059_v8 }
 0x431   :  { %v973_v5 = vadd.f32 %v972_v63, %v971_v16  ;;  %v977_v38 = vadd.f32 %v976_v55, %v930_v25  ;;  %v931_v10 = vmul.f32 %v882_v60, %v1433_v28  ;;  %v922_v0 = vpop.permute.xlu0 %921  ;;  %v969_v27 = vadd.f32 %v968_v37, %v967_v2 }
 0x432   :  { %v1021_v12 = vadd.f32 %v1020_v53, %v1019_v13  ;;  %v1025_v48 = vadd.f32 %v1024_v9, %v938_v26  ;;  %v939_v6 = vmul.f32 %v922_v0, %v1435_v29  ;;  %v1017_v23 = vadd.f32 %v1016_v14, %v1015_v43 }
 0x433   :  { %v978_v7 = vrot.slane %v977_v38, 2  ;;  %v982_v47 = vrot.slane %v931_v10, 4  ;;  %v974_v62 = vrot.slane %v973_v5, 1  ;;  %v1054_v57 = vsel %vm424_vm2, %v963_v56, %v1053_v19 }
 0x434   :  { %v1026_v36 = vrot.slane %v1025_v48, 2  ;;  %v1030_v3 = vrot.slane %v939_v6, 4  ;;  %v1022_v28 = vrot.slane %v1021_v12, 1  ;;  %v1061_v1 = vsel %vm424_vm2, %v1011_v50, %v1060_v59 }
 0x435   :  { %v979_v22 = vadd.f32 %v978_v7, %v977_v38  ;;  %v983_v51 = vadd.f32 %v982_v47, %v931_v10  ;;  %v975_v15 = vadd.f32 %v974_v62, %v973_v5  ;;  %v1055_v16 = vsel %vm426_vm3, %v969_v27, %v1054_v57 }
 0x436   :  { %v1027_v46 = vadd.f32 %v1026_v36, %v1025_v48  ;;  %v1031_v61 = vadd.f32 %v1030_v3, %v939_v6  ;;  %v1023_v17 = vadd.f32 %v1022_v28, %v1021_v12  ;;  %v1062_v58 = vsel %vm426_vm3, %v1017_v23, %v1061_v1 }
 0x437   :  { %v980_v34 = vrot.slane %v979_v22, 1  ;;  %v984_v29 = vrot.slane %v983_v51, 2  ;;  %v1056_v30 = vsel %vm428_vm4, %v975_v15, %v1055_v16 }
 0x438   :  { %v1028_v52 = vrot.slane %v1027_v46, 1  ;;  %v1032_v49 = vrot.slane %v1031_v61, 2  ;;  %v1063_v32 = vsel %vm428_vm4, %v1023_v17, %v1062_v58 }
 0x439   :  { %v985_v54 = vadd.f32 %v984_v29, %v983_v51  ;;  %v981_v20 = vadd.f32 %v980_v34, %v979_v22 }
 0x43a   :  { %v1033_v35 = vadd.f32 %v1032_v49, %v1031_v61  ;;  %v1029_v31 = vadd.f32 %v1028_v52, %v1027_v46 }
 0x43b   :  { %v986_v44 = vrot.slane %v985_v54, 1  ;;  %v1057_v13 = vsel %vm430_vm5, %v981_v20, %v1056_v30 }
 0x43c   :  { %v1034_v25 = vrot.slane %v1033_v35, 1  ;;  %v1064_v11 = vsel %vm430_vm5, %v1029_v31, %v1063_v32 }
 0x43d   :  { %v987_v39 = vadd.f32 %v986_v44, %v985_v54 }
 0x43e   :  { %v1035_v41 = vadd.f32 %v1034_v25, %v1033_v35 }
 0x43f   :  { %v1058_v26 = vsel %vm432_vm6, %v987_v39, %v1057_v13 }
 0x440   :  { %v1065_v33 = vsel %vm432_vm6, %v1035_v41, %v1064_v11  ;;  %1068 = vst [vmem:[#allocation2] sm:$0xff] %v1058_v26 }
 0x441   :  { %1069 = vst [vmem:[#allocation2 + $0x8] sm:$0xff] %v1065_v33 }
 0x442   :  { %1265 = shalt.err (!%p1262_p4)
}
 0x443   :  { %s1266_s26 = scalar_lea.hbm %s1742_s4, 256 }
 0x444   :  { %p1267_p5 = scmp.ne.s32.totalorder %s1742_s4, %s1266_s26  ;;  %p1270_p6 = scmp.lt.u32.totalorder %s1266_s26, %s1742_s4 }
 0x446   :  { %p1272_p7 = pnand %p1270_p6, %p1267_p5 }
 0x448   :  { %1275 = shalt.err (!%p1272_p7)
}
 0x449   :  { %s1280_s5 = smov 128   ;;  %s1281_s6 = smov 8  }
 0x44a   :  { %1081 = dma.vmem_to_hbm [thread:$0]  %s1076_s22, 256, %s1742_s4, [#allocation3], %s1280_s5, %s1280_s5, %s1281_s6  }
 0x44b   :  { %1276 = dma.done.wait [#allocation3], 256  }
 0x44c   :  { %1277 = vsyncadd [#allocation3], 4294967040 }
 0x44d   :  { %1085 = vsyncpa [#allocation3], 1 }

</bundles_post_ra>
